<compile_context>
chip_gen: v6e
topology: v6e:2x2x1
jax: 0.10.0
libtpu: 0.0.40
codegen_flags: <defaults>
</compile_context>

<pallas_src>
import functools

import jax
import jax.numpy as jnp
from jax.experimental import pallas as pl
from jax.experimental.pallas import tpu as pltpu


_LANE = 128      # hidden feature dims padded to a multiple of the lane width
_SUBLANE = 8     # batch tiles must be a multiple of the sublane count


def _round_up(x, m):
    return (x + m - 1) // m * m


def _choose_tm(m):
    """Batch tile size.

    - m < 64: one full-array block (block_shape == array shape is exempt from
      the (8,128) rule, so no batch padding is ever materialized).
    - m >= 64: split into >= 2 grid steps (so the "parallel" batch axis can
      shard across v7x's two TensorCores), capped at 512 rows per step so the
      3-matmul chain amortizes the ~0.35us per-grid-step overhead without
      blowing up vreg pressure too hard.
    """
    if m < 64:
        return m
    cap = 512
    return min(cap, _round_up((m + 1) // 2, _SUBLANE))


def _fused_mlp_kernel(*refs, activations, has_noise):
    """Chained (h @ W_i + b_i) -> act_i with intermediates kept on-chip.

    refs = (x_ref, [noise_ref], w0, b0, w1, b1, ..., o_ref)
    Weights are resident bf16 tiles; matmuls accumulate f32 on the MXU; all
    elementwise work (bias, noise add, relu, sigmoid) stays in f32.
    """
    x_ref, o_ref = refs[0], refs[-1]
    idx = 1
    noise_ref = None
    if has_noise:
        noise_ref = refs[1]
        idx = 2
    wb = refs[idx:-1]

    h = x_ref[...]                                       # (tm, K0), bf16
    for i, act in enumerate(activations):
        w = wb[2 * i][...]                               # (Kp, Np) bf16, resident
        b = wb[2 * i + 1][...]                           # (1, Np)  f32,  resident
        acc = jnp.dot(h.astype(w.dtype), w,
                      preferred_element_type=jnp.float32)
        acc = acc + b                                    # broadcast bias, f32
        if has_noise and i == 0:
            acc = acc + noise_ref[...]                   # GaussianNoise (training)
        if act == "relu":
            h = jnp.maximum(acc, 0.0)
        elif act == "sigmoid":
            # exp + approx reciprocal both route to the EUP slot (no VALU divide).
            h = pl.reciprocal(1.0 + jnp.exp(-acc), approx=True)
        else:                                            # "none"
            h = acc
    o_ref[...] = h.astype(o_ref.dtype)


def _fused_mlp_call(x, padded_layers, activations, noise=None):
    """One pallas_call over batch tiles; weights/biases are resident blocks."""
    m, k0 = x.shape
    n_last = padded_layers[-1][0].shape[1]
    tm = _choose_tm(m)
    grid = (pl.cdiv(m, tm),)

    weight_bytes = sum(w.size * w.dtype.itemsize + b.size * b.dtype.itemsize
                       for w, b, _, _ in padded_layers)
    # Resident inputs are double-buffered by default; single-buffer them only
    # when the model is large enough for that to matter (v7x: 64 MiB VMEM).
    resident_kwargs = (
        {"pipeline_mode": pl.Buffered(1)} if weight_bytes > (4 << 20) else {})

    in_specs = [pl.BlockSpec((tm, k0), lambda i: (i, 0))]
    flat_args = [x]
    noise_bytes = 0
    if noise is not None:
        n0 = noise.shape[1]
        in_specs.append(pl.BlockSpec((tm, n0), lambda i: (i, 0)))
        flat_args.append(noise)
        noise_bytes = noise.size * noise.dtype.itemsize
    for w, b, _, _ in padded_layers:
        kp, np_ = w.shape
        in_specs.append(pl.BlockSpec((kp, np_), lambda i: (0, 0),
                                     **resident_kwargs))
        in_specs.append(pl.BlockSpec((1, np_), lambda i: (0, 0),
                                     **resident_kwargs))
        flat_args += [w, b]

    flops = 2 * m * sum(w.shape[0] * w.shape[1] for w, _, _, _ in padded_layers)
    cost = pl.CostEstimate(
        flops=flops,
        transcendentals=2 * m * n_last,                 # exp + reciprocal
        bytes_accessed=(x.size * x.dtype.itemsize + noise_bytes
                        + weight_bytes + m * n_last * 4))

    kernel = functools.partial(_fused_mlp_kernel,
                               activations=tuple(activations),
                               has_noise=noise is not None)
    return pl.pallas_call(
        kernel,
        out_shape=jax.ShapeDtypeStruct((m, n_last), jnp.float32),
        grid_spec=pltpu.PrefetchScalarGridSpec(
            num_scalar_prefetch=0,
            grid=grid,
            in_specs=in_specs,
            out_specs=pl.BlockSpec((tm, n_last), lambda i: (i, 0)),
        ),
        compiler_params=pltpu.CompilerParams(
            dimension_semantics=("parallel",)),
        cost_estimate=cost,
    )(*flat_args)


def init_emulator_params(layer_sizes, key):
    """Deterministic synthetic parameters (PyTorch Linear shapes: W (out,in), b (out,))."""
    params = []
    for i in range(len(layer_sizes) - 1):
        fan_in, fan_out = layer_sizes[i], layer_sizes[i + 1]
        key, kw, kb = jax.random.split(key, 3)
        bound = 1.0 / (fan_in ** 0.5)
        w = jax.random.uniform(kw, (fan_out, fan_in), jnp.float32, -bound, bound)
        b = jax.random.uniform(kb, (fan_out,), jnp.float32, -bound, bound)
        params.append((w, b))
    return params


def prepare_padded_params(params, compute_dtype=jnp.bfloat16):
    """Kernel-ready params.

    W stored transposed (in, out) as bf16; hidden feature dims zero-padded to
    128 lanes so intermediate activations are lane-dense.  Layer-0 keeps
    K = fan_in (so x needs NO wrapper pad) and the last layer keeps
    N = fan_out (so the output needs NO wrapper slice).  Zero padding is
    semantically inert: padded relu lanes are 0 and padded weight rows are 0.
    """
    n = len(params)
    padded = []
    for i, (w, b) in enumerate(params):
        fan_out, fan_in = w.shape
        kp = fan_in if i == 0 else _round_up(fan_in, _LANE)
        np_ = fan_out if i == n - 1 else _round_up(fan_out, _LANE)
        w_pad = jnp.zeros((kp, np_), compute_dtype).at[:fan_in, :fan_out].set(
            w.T.astype(compute_dtype))
        b_pad = jnp.zeros((1, np_), jnp.float32).at[0, :fan_out].set(b)
        padded.append((w_pad, b_pad, fan_in, fan_out))
    return padded


def emulator_forward(x, padded_params, *, noise_mean=0.0, noise_std=0.0,
                     training=False, noise_key=None):
    """Forward-pass semantics of the PyTorch Emulator module (single fused kernel).

    Eval mode: GaussianNoise is identity.  Training mode: noise is drawn with
    jax.random at the PADDED layer-0 width (no pad op needed; padded lanes are
    killed by layer-1's zero weight rows) and added in-kernel to layer-0's
    pre-ReLU activation — the whole forward is still one pallas_call.
    """
    n = len(padded_params)
    acts = tuple(["relu"] * (n - 1) + ["sigmoid"])
    # Stage the input in bf16: halves input DMA bytes; the kernel casts to
    # bf16 before every matmul anyway, so numerics are unchanged.
    x = x.astype(padded_params[0][0].dtype)
    noise = None
    if training and n > 1:
        if noise_key is None:
            noise_key = jax.random.PRNGKey(0)
        n0_pad = padded_params[0][0].shape[1]
        noise = (jax.random.normal(noise_key, (x.shape[0], n0_pad), jnp.float32)
                 * noise_std + noise_mean)
    return _fused_mlp_call(x, padded_params, acts, noise=noise)


def _reference_forward(x, params):
    """Pure-JAX reference (eval mode, f32) for correctness checking."""
    n = len(params)
    for i, (w, b) in enumerate(params):
        x = x @ w.T + b
        x = jnp.maximum(x, 0.0) if i < n - 1 else jax.nn.sigmoid(x)
    return x


def _reference_forward_train(x, params, noise0_padded):
    """Pure-JAX reference for training mode (noise on layer-0 pre-ReLU output)."""
    n = len(params)
    h = x
    for i, (w, b) in enumerate(params):
        h = h @ w.T + b
        if i == 0 and n > 1:
            h = h + noise0_padded[:, :w.shape[0]]
        h = jnp.maximum(h, 0.0) if i < n - 1 else jax.nn.sigmoid(h)
    return h


if __name__ == "__main__":
    layer_sizes = [32, 64, 64, 16]
    batch = 16

    key = jax.random.PRNGKey(0)
    key, kx = jax.random.split(key)
    x = jax.random.normal(kx, (batch, layer_sizes[0]), jnp.float32)

    params = init_emulator_params(layer_sizes, key)       # PyTorch-layout f32
    padded_params = prepare_padded_params(params)         # kernel-ready bf16/f32

    # --- eval mode (GaussianNoise is identity) ---
    out = emulator_forward(x, padded_params)
    out = jax.block_until_ready(out)
    ref = _reference_forward(x, params)
    assert out.shape == (batch, layer_sizes[-1])
    # bf16 matmul inputs with f32 accumulation + approx reciprocal -> loosened tol.
    assert jnp.allclose(out, ref, atol=2e-2, rtol=2e-2), float(
        jnp.max(jnp.abs(out - ref)))

    # --- training mode (GaussianNoise fused into the same kernel) ---
    nkey = jax.random.PRNGKey(42)
    noise_std = 0.1
    out_tr = emulator_forward(x, padded_params, noise_std=noise_std,
                              training=True, noise_key=nkey)
    out_tr = jax.block_until_ready(out_tr)
    n0_pad = padded_params[0][0].shape[1]
    noise0 = jax.random.normal(nkey, (batch, n0_pad), jnp.float32) * noise_std
    ref_tr = _reference_forward_train(x, params, noise0)
    assert out_tr.shape == (batch, layer_sizes[-1])
    assert jnp.allclose(out_tr, ref_tr, atol=2e-2, rtol=2e-2), float(
        jnp.max(jnp.abs(out_tr - ref_tr)))

    print("KERNEL_OK")
</pallas_src>

<mosaic_0001>
module attributes {stable_mosaic.version = 11 : i64} {
  func.func @_fused_mlp_kernel(%arg0: i32, %arg1: memref<16x32xbf16, #tpu.memory_space<vmem>>, %arg2: memref<32x128xbf16, #tpu.memory_space<vmem>>, %arg3: memref<1x128xf32, #tpu.memory_space<vmem>>, %arg4: memref<128x128xbf16, #tpu.memory_space<vmem>>, %arg5: memref<1x128xf32, #tpu.memory_space<vmem>>, %arg6: memref<128x16xbf16, #tpu.memory_space<vmem>>, %arg7: memref<1x16xf32, #tpu.memory_space<vmem>>, %arg8: memref<16x16xf32, #tpu.memory_space<vmem>>) attributes {dimension_semantics = [#tpu.dimension_semantics<parallel>], iteration_bounds = array<i64: 1>, scalar_prefetch = 0 : i64, scratch_operands = 0 : i64, tpu.core_type = #tpu.core_type<tc>, window_params = [{transform_indices = @transform_0, window_bounds = array<i64: 16, 32>}, {pipeline_mode = #tpu.pipeline_mode<synchronous>, transform_indices = @transform_1, window_bounds = array<i64: 32, 128>}, {pipeline_mode = #tpu.pipeline_mode<synchronous>, transform_indices = @transform_2, window_bounds = array<i64: 1, 128>}, {pipeline_mode = #tpu.pipeline_mode<synchronous>, transform_indices = @transform_3, window_bounds = array<i64: 128, 128>}, {pipeline_mode = #tpu.pipeline_mode<synchronous>, transform_indices = @transform_4, window_bounds = array<i64: 1, 128>}, {pipeline_mode = #tpu.pipeline_mode<synchronous>, transform_indices = @transform_5, window_bounds = array<i64: 128, 16>}, {pipeline_mode = #tpu.pipeline_mode<synchronous>, transform_indices = @transform_6, window_bounds = array<i64: 1, 16>}, {transform_indices = @transform_7, window_bounds = array<i64: 16, 16>}]} {
    %c0 = arith.constant 0 : index
    %c0_0 = arith.constant 0 : index
    %0 = vector.load %arg1[%c0, %c0_0] : memref<16x32xbf16, #tpu.memory_space<vmem>>, vector<16x32xbf16>
    %c0_1 = arith.constant 0 : index
    %c0_2 = arith.constant 0 : index
    %1 = vector.load %arg2[%c0_1, %c0_2] : memref<32x128xbf16, #tpu.memory_space<vmem>>, vector<32x128xbf16>
    %c0_3 = arith.constant 0 : index
    %c0_4 = arith.constant 0 : index
    %2 = vector.load %arg3[%c0_3, %c0_4] : memref<1x128xf32, #tpu.memory_space<vmem>>, vector<1x128xf32>
    %cst = arith.constant dense<0.000000e+00> : vector<16x128xf32>
    %3 = tpu.matmul %0, %1, %cst {dimension_numbers = #tpu.dot_dimension_numbers<[1], [0], [0], [1], [0, 0, 1, 1], [], []>} : vector<16x32xbf16>, vector<32x128xbf16>, vector<16x128xf32> -> vector<16x128xf32>
    %4 = vector.broadcast %2 : vector<1x128xf32> to vector<16x128xf32>
    %5 = arith.addf %3, %4 : vector<16x128xf32>
    %cst_5 = arith.constant 0.000000e+00 : f32
    %6 = vector.broadcast %cst_5 : f32 to vector<16x128xf32>
    %7 = arith.maximumf %5, %6 : vector<16x128xf32>
    %c0_6 = arith.constant 0 : index
    %c0_7 = arith.constant 0 : index
    %8 = vector.load %arg4[%c0_6, %c0_7] : memref<128x128xbf16, #tpu.memory_space<vmem>>, vector<128x128xbf16>
    %c0_8 = arith.constant 0 : index
    %c0_9 = arith.constant 0 : index
    %9 = vector.load %arg5[%c0_8, %c0_9] : memref<1x128xf32, #tpu.memory_space<vmem>>, vector<1x128xf32>
    %10 = arith.truncf %7 : vector<16x128xf32> to vector<16x128xbf16>
    %cst_10 = arith.constant dense<0.000000e+00> : vector<16x128xf32>
    %11 = tpu.matmul %10, %8, %cst_10 {dimension_numbers = #tpu.dot_dimension_numbers<[1], [0], [0], [1], [0, 0, 1, 1], [], []>} : vector<16x128xbf16>, vector<128x128xbf16>, vector<16x128xf32> -> vector<16x128xf32>
    %12 = vector.broadcast %9 : vector<1x128xf32> to vector<16x128xf32>
    %13 = arith.addf %11, %12 : vector<16x128xf32>
    %cst_11 = arith.constant 0.000000e+00 : f32
    %14 = vector.broadcast %cst_11 : f32 to vector<16x128xf32>
    %15 = arith.maximumf %13, %14 : vector<16x128xf32>
    %c0_12 = arith.constant 0 : index
    %c0_13 = arith.constant 0 : index
    %16 = vector.load %arg6[%c0_12, %c0_13] : memref<128x16xbf16, #tpu.memory_space<vmem>>, vector<128x16xbf16>
    %c0_14 = arith.constant 0 : index
    %c0_15 = arith.constant 0 : index
    %17 = vector.load %arg7[%c0_14, %c0_15] : memref<1x16xf32, #tpu.memory_space<vmem>>, vector<1x16xf32>
    %18 = arith.truncf %15 : vector<16x128xf32> to vector<16x128xbf16>
    %cst_16 = arith.constant dense<0.000000e+00> : vector<16x16xf32>
    %19 = tpu.matmul %18, %16, %cst_16 {dimension_numbers = #tpu.dot_dimension_numbers<[1], [0], [0], [1], [0, 0, 1, 1], [], []>} : vector<16x128xbf16>, vector<128x16xbf16>, vector<16x16xf32> -> vector<16x16xf32>
    %20 = vector.broadcast %17 : vector<1x16xf32> to vector<16x16xf32>
    %21 = arith.addf %19, %20 : vector<16x16xf32>
    %cst_17 = arith.constant 0.000000e+00 : f32
    %22 = vector.broadcast %cst_17 : f32 to vector<16x16xf32>
    %23 = arith.subf %22, %21 : vector<16x16xf32>
    %24 = math.exp %23 : vector<16x16xf32>
    %cst_18 = arith.constant 1.000000e+00 : f32
    %25 = vector.broadcast %cst_18 : f32 to vector<16x16xf32>
    %26 = arith.addf %25, %24 : vector<16x16xf32>
    %27 = tpu.reciprocal %26 {approx = true} : vector<16x16xf32> -> vector<16x16xf32>
    %c0_19 = arith.constant 0 : index
    %c0_20 = arith.constant 0 : index
    %28 = vector.load %arg8[%c0_19, %c0_20] : memref<16x16xf32, #tpu.memory_space<vmem>>, vector<16x16xf32>
    tpu.vector_store %arg8[%c0_19, %c0_20], %27 {strides = array<i32>} : memref<16x16xf32, #tpu.memory_space<vmem>>, vector<16x16xf32>,
    return
  }
  func.func @transform_0(%arg0: i32) -> (i32, i32) {
    %c0_i32 = arith.constant 0 : i32
    %c0_i32_0 = arith.constant 0 : i32
    return %arg0, %c0_i32 : i32, i32
  }
  func.func @transform_1(%arg0: i32) -> (i32, i32) {
    %c0_i32 = arith.constant 0 : i32
    %c0_i32_0 = arith.constant 0 : i32
    %c0_i32_1 = arith.constant 0 : i32
    return %c0_i32, %c0_i32_0 : i32, i32
  }
  func.func @transform_2(%arg0: i32) -> (i32, i32) {
    %c0_i32 = arith.constant 0 : i32
    %c0_i32_0 = arith.constant 0 : i32
    %c0_i32_1 = arith.constant 0 : i32
    return %c0_i32, %c0_i32_0 : i32, i32
  }
  func.func @transform_3(%arg0: i32) -> (i32, i32) {
    %c0_i32 = arith.constant 0 : i32
    %c0_i32_0 = arith.constant 0 : i32
    %c0_i32_1 = arith.constant 0 : i32
    return %c0_i32, %c0_i32_0 : i32, i32
  }
  func.func @transform_4(%arg0: i32) -> (i32, i32) {
    %c0_i32 = arith.constant 0 : i32
    %c0_i32_0 = arith.constant 0 : i32
    %c0_i32_1 = arith.constant 0 : i32
    return %c0_i32, %c0_i32_0 : i32, i32
  }
  func.func @transform_5(%arg0: i32) -> (i32, i32) {
    %c0_i32 = arith.constant 0 : i32
    %c0_i32_0 = arith.constant 0 : i32
    %c0_i32_1 = arith.constant 0 : i32
    return %c0_i32, %c0_i32_0 : i32, i32
  }
  func.func @transform_6(%arg0: i32) -> (i32, i32) {
    %c0_i32 = arith.constant 0 : i32
    %c0_i32_0 = arith.constant 0 : i32
    %c0_i32_1 = arith.constant 0 : i32
    return %c0_i32, %c0_i32_0 : i32, i32
  }
  func.func @transform_7(%arg0: i32) -> (i32, i32) {
    %c0_i32 = arith.constant 0 : i32
    %c0_i32_0 = arith.constant 0 : i32
    return %arg0, %c0_i32 : i32, i32
  }
}

</mosaic_0001>

<bundles_post_ra>
// kernel: tpu_custom_call.1
= control target key start
LH: loop header
LB: loop body
LE: loop exit
PB: predicated region body
PF: predicated region fallthrough
CT: control target
= control target key end

     0   :  { %12 = vsyncpa [#allocation3], 0  ;;  %s723_s0 = inlined_call_operand.vmem [shape: bf16[16,32], index: 0, kind: input, shape index: {}]   ;;  %s724_s1 = inlined_call_operand.hbm [shape: bf16[32,128], index: 1, kind: input, shape index: {}]   ;;  %s725_s2 = inlined_call_operand.vmem [shape: f32[1,128], index: 2, kind: input, shape index: {}]   ;;  %s726_s3 = inlined_call_operand.vmem [shape: bf16[128,128], index: 3, kind: input, shape index: {}]   ;;  %s727_s4 = inlined_call_operand.hbm [shape: f32[1,128], index: 4, kind: input, shape index: {}]   ;;  %s728_s5 = inlined_call_operand.vmem [shape: bf16[128,16], index: 5, kind: input, shape index: {}]   ;;  %s729_s6 = inlined_call_operand.vmem [shape: f32[1,16], index: 6, kind: input, shape index: {}]   ;;  %s730_s7 = inlined_call_operand.hbm [shape: f32[16,16], index: 7, kind: output, shape index: {}]  }
   0x1   :  { %13 = vsyncpa [#allocation6], 0 }
   0x2   :  { %14 = vsyncpa [#allocation4], 0  ;;  %s584_s24 = smov [#allocation2]  }
   0x3   :  { %s22_s25 = sshll.u32 %s584_s24, 4  ;;  %s23_s25 = int_to_ptr.vmem [resolvable:$true] %s22_s25 }
   0x4   :  { %s526_s26 = scalar_lea.vmem %s23_s25, 256  ;;  %p531_p1 = scmp.lt.s32.totalorder %s23_s25, %s23_s25 }
   0x5   :  { %p527_p0 = scmp.ne.s32.totalorder %s23_s25, %s526_s26  ;;  %p532_p2 = scmp.lt.s32.totalorder %s526_s26, %s526_s26 }
   0x7   :  { %p533_p3 = por %p532_p2, %p531_p1 }
   0x9   :  { %p534_p4 = pnand %p533_p3, %p527_p0 }
   0xb   :  { %537 = shalt.err (!%p534_p4)
}
   0xc   :  { %s585_s27 = smov 64   ;;  %s586_s28 = smov 4  }
   0xd   :  { %28 = dma.hbm_to_vmem [thread:$0]  %s724_s1, 256, %s23_s25, [#allocation3], %s585_s27, %s585_s27, %s586_s28  }
   0xe   :  { %s587_s8 = smov [#allocation5]  }
   0xf   :  { %s39_s9 = sshll.u32 %s587_s8, 4  ;;  %s40_s9 = int_to_ptr.vmem [resolvable:$true] %s39_s9 }
  0x10   :  { %s546_s10 = scalar_lea.vmem %s40_s9, 16  ;;  %s550_s11 = scalar_lea.vmem %s40_s9, 32 }
  0x11   :  { %p547_p5 = scmp.ne.s32.totalorder %s40_s9, %s546_s10  ;;  %p551_p6 = scmp.lt.s32.totalorder %s40_s9, %s40_s9 }
  0x12   :  { %p552_p7 = scmp.lt.s32.totalorder %s550_s11, %s546_s10 }
  0x14   :  { %p553_p8 = por %p552_p7, %p551_p6 }
  0x16   :  { %p554_p9 = pnand %p553_p8, %p547_p5 }
  0x18   :  { %557 = shalt.err (!%p554_p9)
}
  0x19   :  { %42 = dma.hbm_to_vmem [thread:$0]  %s727_s4, 16, %s40_s9, [#allocation6]  }
  0x1a   :  { %578 = dma.done.wait [#allocation3], 256  }
  0x1b   :  { %579 = vsyncadd [#allocation3], 4294967040 }
  0x1c   :  { %580 = dma.done.wait [#allocation6], 16  }
  0x1d   :  { %581 = vsyncadd [#allocation6], 4294967280  ;;  %v588_v0 = vmov 0.0   ;;  %vm589_vm0 = vmmov 0   ;;  %v491_v1 = vld [vmem:[#allocation2 + $0x8] sm:$0xff]   ;;  %v492_v2 = vld [vmem:[#allocation2] sm:$0xff]  }
  0x1e   :  { %434 = vmatprep.subr.bf16.mxu0 %v588_v0  ;;  %438 = vmatprep.mubr.msk.bf16.mxu0 %vm589_vm0, %v588_v0  ;;  %v494_v3 = vld [vmem:[%s726_s3 + $0x38] sm:$0xff]   ;;  %v493_v4 = vld [vmem:[%s723_s0] sm:$0xff]   ;;  %v495_v5 = vld [vmem:[%s726_s3 + $0x30] sm:$0xff]   ;;  %vm84_vm1 = vcmask 261120   ;;  %vm369_vm2 = vcmask 130048  }
  0x1f   :  { %442 = vmatprep.subr.bf16.mxu1 %v588_v0  ;;  %458 = vmatprep.mubr.msk.bf16.mxu1 %vm589_vm0, %v588_v0  ;;  %v496_v6 = vld [vmem:[%s726_s3 + $0x28] sm:$0xff]   ;;  %v497_v7 = vld [vmem:[%s726_s3 + $0x20] sm:$0xff]   ;;  %v498_v8 = vld [vmem:[%s726_s3 + $0x18] sm:$0xff]  }
  0x20   :  { %435 = vmatpush3.bf16.msra.mxu0 %v491_v1  ;;  %443 = vmatpush3.bf16.msra.mxu1 %v494_v3  ;;  %v499_v9 = vld [vmem:[%s726_s3 + $0x10] sm:$0xff]   ;;  %v500_v10 = vld [vmem:[%s726_s3 + $0x8] sm:$0xff]   ;;  %v501_v11 = vld [vmem:[%s726_s3] sm:$0xff]  }
  0x21   :  { %436 = vmatprep.subr.bf16.mxu0 %v588_v0  ;;  %444 = vmatprep.subr.bf16.mxu1 %v588_v0  ;;  %v502_v12 = vld [vmem:[%s728_s5 + $0x38] sm:$0xff]   ;;  %v503_v13 = vld [vmem:[%s728_s5 + $0x30] sm:$0xff]   ;;  %v504_v14 = vld [vmem:[%s728_s5 + $0x28] sm:$0xff]  }
  0x22   :  { %v505_v15 = vld [vmem:[%s728_s5 + $0x20] sm:$0xff]   ;;  %v506_v16 = vld [vmem:[%s728_s5 + $0x18] sm:$0xff]   ;;  %v507_v27 = vld [vmem:[%s728_s5 + $0x10] sm:$0xff]  }
  0x23   :  { %v390_v17 = vld [vmem:[%s725_s2] ss:$0 sm:$0xff]  ;;  %v508_v28 = vld [vmem:[%s728_s5 + $0x8] sm:$0xff]   ;;  %v395_v30 = vld [vmem:[#allocation5] ss:$0 sm:$0xff] }
  0x24   :  { %437 = vmatpush3.bf16.msra.mxu0 %v492_v2  ;;  %445 = vmatpush3.bf16.msra.mxu1 %v495_v5  ;;  %v509_v29 = vld [vmem:[%s728_s5] sm:$0xff]   ;;  %s590_s5 = smov [#allocation7]  }
  0x25   :  { %462 = vmatprep.subr.bf16.mxu0 %v588_v0  ;;  %446 = vmatprep.subr.bf16.mxu1 %v588_v0  ;;  %v404_v40 = vld [vmem:[%s729_s6] ss:$0 sm:$0xff]  ;;  %s377_s6 = sshll.u32 %s590_s5, 4  ;;  %s378_s6 = int_to_ptr.vmem [resolvable:$true] %s377_s6 }
  0x26   :  { %s558_s21 = scalar_lea.vmem %s378_s6, 256  ;;  %p563_p11 = scmp.lt.s32.totalorder %s378_s6, %s378_s6 }
  0x27   :  { %439 = vmatmul.mubr.msk.bf16.vlgmr.msra.gmra.mxu0 %vm84_vm1, %v493_v4  ;;  %p559_p10 = scmp.ne.s32.totalorder %s378_s6, %s558_s21  ;;  %p564_p12 = scmp.lt.s32.totalorder %s558_s21, %s558_s21 }
  0x28   :  { %478 = vmatprep.mubr.msk.bf16.mxu0 %vm589_vm0, %v588_v0  ;;  %447 = vmatpush3.bf16.msra.mxu1 %v496_v6 }
  0x29   :  { %448 = vmatprep.subr.bf16.mxu1 %v588_v0  ;;  %463 = vmatpush3.bf16.msra.mxu0 %v502_v12  ;;  %p565_p13 = por %p564_p12, %p563_p11 }
  0x2a   :  { %464 = vmatprep.subr.bf16.mxu0 %v588_v0 }
  0x2b   :  { %p566_p0 = pnand %p565_p13, %p559_p10 }
  0x2c   :  { %449 = vmatpush3.bf16.msra.mxu1 %v497_v7 }
  0x2d   :  { %450 = vmatprep.subr.bf16.mxu1 %v588_v0  ;;  %465 = vmatpush3.bf16.msra.mxu0 %v503_v13 }
  0x2e   :  { %466 = vmatprep.subr.bf16.mxu0 %v588_v0 }
  0x30   :  { %451 = vmatpush3.bf16.msra.mxu1 %v498_v8 }
  0x31   :  { %452 = vmatprep.subr.bf16.mxu1 %v588_v0  ;;  %467 = vmatpush3.bf16.msra.mxu0 %v504_v14 }
  0x32   :  { %468 = vmatprep.subr.bf16.mxu0 %v588_v0 }
  0x34   :  { %453 = vmatpush3.bf16.msra.mxu1 %v499_v9 }
  0x35   :  { %454 = vmatprep.subr.bf16.mxu1 %v588_v0  ;;  %469 = vmatpush3.bf16.msra.mxu0 %v505_v15 }
  0x36   :  { %470 = vmatprep.subr.bf16.mxu0 %v588_v0 }
  0x38   :  { %455 = vmatpush3.bf16.msra.mxu1 %v500_v10 }
  0x39   :  { %456 = vmatprep.subr.bf16.mxu1 %v588_v0  ;;  %471 = vmatpush3.bf16.msra.mxu0 %v506_v16 }
  0x3a   :  { %472 = vmatprep.subr.bf16.mxu0 %v588_v0 }
  0x3c   :  { %457 = vmatpush3.bf16.msra.mxu1 %v501_v11 }
  0x3d   :  { %473 = vmatpush3.bf16.msra.mxu0 %v507_v27 }
  0x3e   :  { %474 = vmatprep.subr.bf16.mxu0 %v588_v0 }
  0x41   :  { %475 = vmatpush3.bf16.msra.mxu0 %v508_v28 }
  0x42   :  { %476 = vmatprep.subr.bf16.mxu0 %v588_v0 }
  0x45   :  { %477 = vmatpush3.bf16.msra.mxu0 %v509_v29 }
  0xe7   :  { %v122_v18 = vpop.f32.mrf.mxu0 }
  0xe8   :  { %v123_v20 = vadd.f32 %v390_v17, %v122_v18 }
  0xe9   :  { %v440_v19 = vpop.f32.mrf.mxu0 }
  0xea   :  { %v129_v24 = vmax.f32 %v123_v20, 0.0 }
  0xeb   :  { %v125_v21 = vpop.f32.mrf.mxu0 }
  0xec   :  { %v126_v22 = vadd.f32 %v390_v17, %v125_v21 }
  0xed   :  { %v441_v23 = vpop.f32.mrf.mxu0 }
  0xee   :  { %v130_v25 = vmax.f32 %v126_v22, 0.0 }
  0xf0   :  { %v148_v26 = vpack.c.bf16 %v130_v25, %v129_v24 }
  0xf2   :  { %459 = vmatmul.mubr.bf16.vlgmr.msra.gmra.mxu1 %v148_v26 }
 0x1b2   :  { %v237_v31 = vpop.f32.mrf.mxu1 }
 0x1b3   :  { %v238_v33 = vadd.f32 %v395_v30, %v237_v31 }
 0x1b4   :  { %v460_v32 = vpop.f32.mrf.mxu1 }
 0x1b5   :  { %v244_v37 = vmax.f32 %v238_v33, 0.0 }
 0x1b6   :  { %v240_v34 = vpop.f32.mrf.mxu1 }
 0x1b7   :  { %v241_v35 = vadd.f32 %v395_v30, %v240_v34 }
 0x1b8   :  { %v461_v36 = vpop.f32.mrf.mxu1 }
 0x1b9   :  { %v245_v38 = vmax.f32 %v241_v35, 0.0 }
 0x1bb   :  { %v263_v39 = vpack.c.bf16 %v245_v38, %v244_v37 }
 0x1bd   :  { %479 = vmatmul.mubr.bf16.vlgmr.msra.gmra.mxu0 %v263_v39 }
 0x27d   :  { %v352_v41 = vpop.f32.mrf.mxu0 }
 0x27e   :  { %v353_v42 = vadd.f32 %v404_v40, %v352_v41 }
 0x27f   :  { %v480_v43 = vpop.f32.mrf.mxu0 }
 0x280   :  { %v359_v44 = vsub.f32 0.0, %v353_v42 }
 0x281   :  { %v355_v45 = vpop.f32.mrf.mxu0 }
 0x282   :  { %v361_v46 = vmul.f32 1.442695, %v359_v44  ;;  %v356_v47 = vadd.f32 %v404_v40, %v355_v45 }
 0x283   :  { %v481_v48 = vpop.f32.mrf.mxu0 }
 0x284   :  { %510 = vpow2.f32 %v361_v46  ;;  %v360_v49 = vsub.f32 0.0, %v356_v47 }
 0x286   :  { %v363_v50 = vmul.f32 1.442695, %v360_v49 }
 0x288   :  { %512 = vpow2.f32 %v363_v50 }
 0x291   :  { %v511_v51 = vpop.eup %510 }
 0x292   :  { %v365_v52 = vadd.f32 1.0, %v511_v51 }
 0x294   :  { %514 = vrcp.f32 %v365_v52 }
 0x295   :  { %v513_v53 = vpop.eup %512 }
 0x296   :  { %v366_v54 = vadd.f32 1.0, %v513_v53 }
 0x298   :  { %516 = vrcp.f32 %v366_v54 }
 0x2a1   :  { %v515_v55 = vpop.eup %514 }
 0x2a2   :  { %370 = vst.msk [vmem:[#allocation7] sm:$0xff] %vm369_vm2, %v515_v55 }
 0x2a5   :  { %v517_v56 = vpop.eup %516 }
 0x2a6   :  { %371 = vst.msk [vmem:[#allocation7 + $0x8] sm:$0xff] %vm369_vm2, %v517_v56 }
 0x2a7   :  { %569 = shalt.err (!%p566_p0)
}
 0x2a8   :  { %s591_s22 = smov 128   ;;  %s592_s23 = smov 8  }
 0x2a9   :  { %383 = dma.vmem_to_hbm [thread:$0]  %s378_s6, 256, %s730_s7, [#allocation4], %s591_s22, %s591_s22, %s592_s23  }
 0x2aa   :  { %582 = dma.done.wait [#allocation4], 256  }
 0x2ab   :  { %583 = vsyncadd [#allocation4], 4294967040 }
 0x2ac   :  { %387 = vsyncpa [#allocation3], 1 }
 0x2ad   :  { %388 = vsyncpa [#allocation6], 1 }
 0x2ae   :  { %389 = vsyncpa [#allocation4], 1 }

</bundles_post_ra>
